<compile_context>
chip_gen: v6e
topology: v6e:2x2x1
jax: 0.10.0
libtpu: 0.0.40
codegen_flags: <defaults>
</compile_context>

<pallas_src>
import functools
import math

import jax
import jax.numpy as jnp
import numpy as np
from jax.experimental import pallas as pl
from jax.experimental.pallas import tpu as pltpu


# ----------------------------------------------------------------------------
# Fused kernel: 3x3 replicate-pad conv (single K=9*Cin matmul) + bias + sigmoid
# ----------------------------------------------------------------------------
def _fused_conv_kernel(xf_ref, w_ref, b_ref, o_ref, *, height, wp, cin):
    """One batch image per grid step.

    xf_ref : (1, Cin, (H+3)*wp)   replicate-padded, dropout-applied, flattened slab
    w_ref  : (Cout_pad, 9*Cin)    taps folded onto the contraction axis
    b_ref  : (Cout_pad, 1)        f32
    o_ref  : (1, Cout_pad, H*wp)  f32 wide output (columns >= W of each row = garbage)
    """
    m = height * wp
    xv = xf_ref[0]                                   # (Cin, L) VMEM-resident slab

    # Stack the 9 static lane-shifted tap windows on the sublane (K) axis:
    # one (9*Cin, M) operand -> a single MXU matmul with K = 9*Cin.
    taps = [xv[:, dy * wp + dx: dy * wp + dx + m]
            for dy in range(3) for dx in range(3)]
    xcat = jnp.concatenate(taps, axis=0)             # (9*Cin, M)

    acc = jnp.dot(w_ref[...], xcat, preferred_element_type=jnp.float32)
    acc = acc + b_ref[...]                           # (Cout_pad, 1) broadcast over lanes

    # sigmoid epilogue in f32: exp + reciprocal live on the EUP slot.
    o_ref[0] = (pl.reciprocal(1.0 + jnp.exp(-acc), approx=False)).astype(o_ref.dtype)


# ----------------------------------------------------------------------------
# Wrapper: dropout + replicate pad (XLA-fused producer) + fused Pallas conv
# ----------------------------------------------------------------------------
@functools.partial(jax.jit, static_argnames=("drop_rate", "compute_dtype"))
def conv_forward(x, weight, bias, key, drop_rate=0.3, compute_dtype=jnp.bfloat16):
    """x: (N, Cin, H, W) f32; weight: (Cout, Cin, 3, 3); bias: (Cout,) -> (N, Cout, H, W)."""
    n, cin, height, width = x.shape
    cout = weight.shape[0]

    # Wide-row pitch: >= W+2 and chosen so H*wp % 128 == 0 (lane-dense unmasked output
    # stores), unless that would more than double the row width.
    base_wp = width + 2
    step = 128 // math.gcd(height, 128)
    wp = ((base_wp + step - 1) // step) * step
    if wp > 2 * base_wp:
        wp = base_wp
    m = height * wp
    lflat = (height + 3) * wp                 # +1 top, +2 bottom replicate/slack rows
    cout_pad = ((cout + 7) // 8) * 8          # sublane-align the small output axis

    # --- dropout (train-mode semantics of F.dropout) -------------------------
    if drop_rate > 0.0:
        keep = jax.random.bernoulli(key, 1.0 - drop_rate, x.shape)
        x = jnp.where(keep, x * (1.0 / (1.0 - drop_rate)), 0.0)

    # --- replicate pad + flatten + cast to MXU dtype (single XLA producer) ----
    # TODO(synk): move pad + dropout inside the kernel to avoid this slab HBM pass.
    xpad = jnp.pad(x, ((0, 0), (0, 0), (1, 2), (1, wp - width - 1)), mode="edge")
    xf = xpad.reshape(n, cin, lflat).astype(compute_dtype)

    # --- weights: (Cout, Cin, 3, 3) -> (Cout_pad, 9*Cin), taps on contraction --
    wk = jnp.transpose(weight, (0, 2, 3, 1)).reshape(cout, 9 * cin)
    if cout_pad != cout:
        wk = jnp.pad(wk, ((0, cout_pad - cout), (0, 0)))
    wk = wk.astype(compute_dtype)
    bp = jnp.pad(bias, (0, cout_pad - cout)).reshape(cout_pad, 1).astype(jnp.float32)

    kern = functools.partial(_fused_conv_kernel, height=height, wp=wp, cin=cin)

    # --- VMEM / cost bookkeeping derived from actual buffer sizes -------------
    itemsize = jnp.dtype(compute_dtype).itemsize
    xf_bytes = cin * lflat * itemsize
    out_bytes = cout_pad * m * 4
    w_bytes = cout_pad * 9 * cin * itemsize + cout_pad * 4
    vmem_limit = int(min(max(2 * (xf_bytes + out_bytes) + w_bytes + (4 << 20), 8 << 20),
                         100 << 20))
    cost = pl.CostEstimate(
        flops=2 * n * cout_pad * 9 * cin * m,
        transcendentals=n * cout_pad * m,
        bytes_accessed=n * (xf_bytes + out_bytes) + w_bytes,
    )

    out_wide = pl.pallas_call(
        kern,
        out_shape=jax.ShapeDtypeStruct((n, cout_pad, m), jnp.float32),
        grid=(n,),
        in_specs=[
            pl.BlockSpec((1, cin, lflat), lambda i: (i, 0, 0)),     # per-image slab
            pl.BlockSpec((cout_pad, 9 * cin), lambda i: (0, 0)),    # resident weights
            pl.BlockSpec((cout_pad, 1), lambda i: (0, 0)),          # resident bias
        ],
        out_specs=pl.BlockSpec((1, cout_pad, m), lambda i: (i, 0, 0)),
        compiler_params=pltpu.CompilerParams(
            dimension_semantics=("parallel",),      # batch over TCs / megacore
            vmem_limit_bytes=vmem_limit,
        ),
        cost_estimate=cost,
    )(xf, wk, bp)

    # wide -> NCHW: reshape + crop.  (A fused consumer could take the wide
    # (Cout_pad, H, wp) layout directly and skip this extra HBM pass.)
    out = out_wide.reshape(n, cout_pad, height, wp)[:, :cout, :, :width]
    return out


# ----------------------------------------------------------------------------
# Driver
# ----------------------------------------------------------------------------
if __name__ == "__main__":
    N, CIN, COUT, H, W = 2, 4, 8, 16, 16

    root = jax.random.PRNGKey(0)
    kx, kw, kb, kdrop = jax.random.split(root, 4)
    x = jax.random.normal(kx, (N, CIN, H, W), dtype=jnp.float32)
    fan_in = CIN * 3 * 3
    bound = 1.0 / float(np.sqrt(fan_in))
    weight = jax.random.uniform(kw, (COUT, CIN, 3, 3), jnp.float32, -bound, bound)
    bias = jax.random.uniform(kb, (COUT,), jnp.float32, -bound, bound)

    # Reference (dropout is identity at p=0) vs lax conv on the replicate-padded input.
    xpad_ref = jnp.pad(x, ((0, 0), (0, 0), (1, 1), (1, 1)), mode="edge")
    ref = jax.lax.conv_general_dilated(
        xpad_ref, weight, window_strides=(1, 1), padding="VALID",
        dimension_numbers=("NCHW", "OIHW", "NCHW"))
    ref = jax.nn.sigmoid(ref + bias.reshape(1, -1, 1, 1))

    # f32 compute path: tight correctness check.
    got_f32 = conv_forward(x, weight, bias, kdrop, drop_rate=0.0,
                           compute_dtype=jnp.float32)
    assert got_f32.shape == (N, COUT, H, W)
    assert jnp.allclose(got_f32, ref, atol=1e-5), "f32 path mismatch vs reference conv"

    # bf16 MXU path (default): loose check.
    got_bf16 = conv_forward(x, weight, bias, kdrop, drop_rate=0.0)
    assert jnp.allclose(got_bf16, ref, atol=2e-2), "bf16 path mismatch vs reference conv"

    # Full forward with dropout active (module default drop_rate=0.3).
    out = conv_forward(x, weight, bias, kdrop, drop_rate=0.3)
    jax.block_until_ready(out)
    assert out.shape == (N, COUT, H, W)
    assert bool(jnp.all(jnp.isfinite(out)))
    print("KERNEL_OK")
</pallas_src>

<mosaic_0001>
module attributes {stable_mosaic.version = 11 : i64} {
  func.func @_fused_conv_kernel(%arg0: i32, %arg1: memref<1x4x456xf32, #tpu.memory_space<vmem>>, %arg2: memref<8x36xf32, #tpu.memory_space<vmem>>, %arg3: memref<8x1xf32, #tpu.memory_space<vmem>>, %arg4: memref<1x8x384xf32, #tpu.memory_space<vmem>>) attributes {dimension_semantics = [#tpu.dimension_semantics<parallel>], iteration_bounds = array<i64: 2>, scalar_prefetch = 0 : i64, scratch_operands = 0 : i64, tpu.core_type = #tpu.core_type<tc>, window_params = [{transform_indices = @transform_0, window_bounds = array<i64: 1, 4, 456>}, {pipeline_mode = #tpu.pipeline_mode<synchronous>, transform_indices = @transform_1, window_bounds = array<i64: 8, 36>}, {pipeline_mode = #tpu.pipeline_mode<synchronous>, transform_indices = @transform_2, window_bounds = array<i64: 8, 1>}, {transform_indices = @transform_3, window_bounds = array<i64: 1, 8, 384>}]} {
    %c0 = arith.constant 0 : index
    %c0_0 = arith.constant 0 : index
    %c0_1 = arith.constant 0 : index
    %0 = vector.load %arg1[%c0, %c0_0, %c0_1] : memref<1x4x456xf32, #tpu.memory_space<vmem>>, vector<1x4x456xf32>
    %1 = vector.shape_cast %0 : vector<1x4x456xf32> to vector<4x456xf32>
    %2 = vector.extract_strided_slice %1 {offsets = [0, 0], sizes = [4, 384], strides = [1, 1]} : vector<4x456xf32> to vector<4x384xf32>
    %3 = vector.extract_strided_slice %1 {offsets = [0, 1], sizes = [4, 384], strides = [1, 1]} : vector<4x456xf32> to vector<4x384xf32>
    %4 = vector.extract_strided_slice %1 {offsets = [0, 2], sizes = [4, 384], strides = [1, 1]} : vector<4x456xf32> to vector<4x384xf32>
    %5 = vector.extract_strided_slice %1 {offsets = [0, 24], sizes = [4, 384], strides = [1, 1]} : vector<4x456xf32> to vector<4x384xf32>
    %6 = vector.extract_strided_slice %1 {offsets = [0, 25], sizes = [4, 384], strides = [1, 1]} : vector<4x456xf32> to vector<4x384xf32>
    %7 = vector.extract_strided_slice %1 {offsets = [0, 26], sizes = [4, 384], strides = [1, 1]} : vector<4x456xf32> to vector<4x384xf32>
    %8 = vector.extract_strided_slice %1 {offsets = [0, 48], sizes = [4, 384], strides = [1, 1]} : vector<4x456xf32> to vector<4x384xf32>
    %9 = vector.extract_strided_slice %1 {offsets = [0, 49], sizes = [4, 384], strides = [1, 1]} : vector<4x456xf32> to vector<4x384xf32>
    %10 = vector.extract_strided_slice %1 {offsets = [0, 50], sizes = [4, 384], strides = [1, 1]} : vector<4x456xf32> to vector<4x384xf32>
    %11 = tpu.concatenate %2, %3, %4, %5, %6, %7, %8, %9, %10 in 0 : vector<4x384xf32>, vector<4x384xf32>, vector<4x384xf32>, vector<4x384xf32>, vector<4x384xf32>, vector<4x384xf32>, vector<4x384xf32>, vector<4x384xf32>, vector<4x384xf32> -> vector<36x384xf32>
    %c0_2 = arith.constant 0 : index
    %c0_3 = arith.constant 0 : index
    %12 = vector.load %arg2[%c0_2, %c0_3] : memref<8x36xf32, #tpu.memory_space<vmem>>, vector<8x36xf32>
    %cst = arith.constant dense<0.000000e+00> : vector<8x384xf32>
    %13 = tpu.matmul %12, %11, %cst {dimension_numbers = #tpu.dot_dimension_numbers<[1], [0], [0], [1], [0, 0, 1, 1], [], []>} : vector<8x36xf32>, vector<36x384xf32>, vector<8x384xf32> -> vector<8x384xf32>
    %c0_4 = arith.constant 0 : index
    %c0_5 = arith.constant 0 : index
    %14 = vector.load %arg3[%c0_4, %c0_5] : memref<8x1xf32, #tpu.memory_space<vmem>>, vector<8x1xf32>
    %15 = vector.broadcast %14 : vector<8x1xf32> to vector<8x384xf32>
    %16 = arith.addf %13, %15 : vector<8x384xf32>
    %cst_6 = arith.constant 0.000000e+00 : f32
    %17 = vector.broadcast %cst_6 : f32 to vector<8x384xf32>
    %18 = arith.subf %17, %16 : vector<8x384xf32>
    %19 = math.exp %18 : vector<8x384xf32>
    %cst_7 = arith.constant 1.000000e+00 : f32
    %20 = vector.broadcast %cst_7 : f32 to vector<8x384xf32>
    %21 = arith.addf %20, %19 : vector<8x384xf32>
    %22 = tpu.reciprocal %21 : vector<8x384xf32> -> vector<8x384xf32>
    %c0_8 = arith.constant 0 : index
    %c0_9 = arith.constant 0 : index
    %c0_10 = arith.constant 0 : index
    %23 = vector.load %arg4[%c0_8, %c0_9, %c0_10] : memref<1x8x384xf32, #tpu.memory_space<vmem>>, vector<1x8x384xf32>
    %24 = vector.shape_cast %23 : vector<1x8x384xf32> to vector<8x384xf32>
    %25 = vector.shape_cast %22 : vector<8x384xf32> to vector<1x8x384xf32>
    tpu.vector_store %arg4[%c0_8, %c0_9, %c0_10], %25 {strides = array<i32>} : memref<1x8x384xf32, #tpu.memory_space<vmem>>, vector<1x8x384xf32>,
    return
  }
  func.func @transform_0(%arg0: i32) -> (i32, i32, i32) {
    %c0_i32 = arith.constant 0 : i32
    %c0_i32_0 = arith.constant 0 : i32
    %c0_i32_1 = arith.constant 0 : i32
    return %arg0, %c0_i32, %c0_i32_0 : i32, i32, i32
  }
  func.func @transform_1(%arg0: i32) -> (i32, i32) {
    %c0_i32 = arith.constant 0 : i32
    %c0_i32_0 = arith.constant 0 : i32
    %c0_i32_1 = arith.constant 0 : i32
    return %c0_i32, %c0_i32_0 : i32, i32
  }
  func.func @transform_2(%arg0: i32) -> (i32, i32) {
    %c0_i32 = arith.constant 0 : i32
    %c0_i32_0 = arith.constant 0 : i32
    %c0_i32_1 = arith.constant 0 : i32
    return %c0_i32, %c0_i32_0 : i32, i32
  }
  func.func @transform_3(%arg0: i32) -> (i32, i32, i32) {
    %c0_i32 = arith.constant 0 : i32
    %c0_i32_0 = arith.constant 0 : i32
    %c0_i32_1 = arith.constant 0 : i32
    return %arg0, %c0_i32, %c0_i32_0 : i32, i32, i32
  }
}

</mosaic_0001>

<bundles_post_ra>
// kernel: conv_forward.1
= control target key start
LH: loop header
LB: loop body
LE: loop exit
PB: predicated region body
PF: predicated region fallthrough
CT: control target
= control target key end

     0   :  { %s652_s12 = smov 0   ;;  %s762_s0 = inlined_call_operand.vmem [shape: f32[2,4,456], index: 0, kind: input, shape index: {}]   ;;  %s763_s1 = inlined_call_operand.vmem [shape: f32[8,36], index: 1, kind: input, shape index: {}]   ;;  %s764_s2 = inlined_call_operand.vmem [shape: f32[8,1], index: 2, kind: input, shape index: {}]   ;;  %s765_s3 = inlined_call_operand.vmem [shape: f32[2,8,384], index: 3, kind: output, shape index: {}]  }
   0x1 LB: > { %s541_s13 = sadd.s32 4294967295, %s619_s12   ;;  %p545_p0 = scmp.ge.s32.totalorder %s619_s12, 1  ;;  %s619_s12 = sphi %s652_s12, %s13_s12  }
   0x2   : > { %p137_p1 = scmp.lt.s32.totalorder %s619_s12, 3 }
   0x4   : > { %p138_p2 = pnand %p545_p0, %p137_p1 }
   0x5   : > { %p161_p3 = scmp.lt.s32.totalorder (!%p138_p2), %s541_s13, 1  ;;  %s621_s18 = smov (!%p138_p2), 80  }
   0x6   : > { %141 = sbr.rel (%p138_p2) target bundleno = 425 (0x1a9), region = 32  ;;  %s622_s19 = smov (!%p138_p2), 78  }
   0x7   : > { %s623_s20 = smov (!%p138_p2), 79   ;;  %s625_s21 = smov (!%p138_p2), 103  }
   0x8   : > { %s626_s22 = smov (!%p138_p2), 102   ;;  %s627_s23 = smov (!%p138_p2), 126  }
   0x9   : > { %s628_s24 = smov (!%p138_p2), 104   ;;  %s630_s25 = smov (!%p138_p2), 127  }
   0xb   : > { %s767_s13 = smov (!%p161_p3, %s541_s13), 1  ;;  %v624_v4 = vmov 0.0   ;;  %vm629_vm0 = vmmov 0   ;;  %v631_v7 = vmov 0   ;;  %v311_v8 = vld [vmem:[%s764_s2] sm:$0xff]  ;;  %vm293_vm1 = vcmask 637952  }
   0xc   : > { %s556_s14 = sshll.u32 %s767_s13, 4  ;;  %563 = vmatprep.subr.mxu1 %v624_v4  ;;  %391 = vmatprep.mubr.f32.mxu0 %v624_v4  ;;  %vm297_vm2 = vcmask 1043456   ;;  %vm278_vm3 = vcmask 646144   ;;  %vm263_vm4 = vcmask 654336   ;;  %vm233_vm5 = vcmask 842752   ;;  %s576_s30 = smul.u32 24, %s767_s13 }
   0xd   : > { %s165_s17 = scalar_lea.vmem %s762_s0, %s556_s14  ;;  %573 = vmatprep.mubr.msk.f32.mxu1 %vm629_vm0, %v624_v4  ;;  %596 = vset.pattern.permute.xlu0 %v631_v7  ;;  %vm248_vm6 = vcmask 834560   ;;  %vm203_vm7 = vcmask 1031168   ;;  %vm218_vm8 = vcmask 850944   ;;  %vm187_vm9 = vcmask 1039360  }
   0xe   : > { %v666_v0 = vld [vmem:[%s165_s17 + $0x8] sm:$0xff]  ;;  %v668_v1 = vld [vmem:[%s165_s17] sm:$0xff]  ;;  %vm317_vm10 = vcmask 293888   ;;  %s170_s6 = scalar_lea.vmem %s765_s3, %s576_s30 }
   0xf   : > { %259 = vrot.lane.b32.xlu1 %v666_v0, %s621_s18  ;;  %289 = vrot.lane.b32.xlu0 %v666_v0, %s622_s19  ;;  %v674_v2 = vcombine.high %v668_v1, %v668_v1  ;;  %v178_v3 = vcombine.low %v666_v0, %v666_v0  ;;  %v177_v5 = vcombine.low %v668_v1, %v668_v1 }
  0x10   : > { %v194_v6 = vcombine.high %v666_v0, %v666_v0 }
  0x13   : > { %272 = vrot.lane.b32.xlu0 %v668_v1, %s623_s20  ;;  %257 = vrot.lane.b32.xlu1 %v674_v2, %s621_s18 }
  0x17   : > { %274 = vrot.lane.b32.xlu1 %v178_v3, %s623_s20  ;;  %287 = vrot.lane.b32.xlu0 %v674_v2, %s622_s19 }
  0x1b   : > { %255 = vrot.lane.b32.xlu1 %v668_v1, %s621_s18  ;;  %285 = vrot.lane.b32.xlu0 %v668_v1, %s622_s19 }
  0x1f   : > { %227 = vrot.lane.b32.xlu1 %v674_v2, %s625_s21  ;;  %270 = vrot.lane.b32.xlu0 %v177_v5, %s623_s20 }
  0x23   : > { %242 = vrot.lane.b32.xlu1 %v668_v1, %s626_s22  ;;  %229 = vrot.lane.b32.xlu0 %v666_v0, %s625_s21 }
  0x27   : > { %291 = vrot.lane.b32.xlu1 %v194_v6, %s622_s19  ;;  %244 = vrot.lane.b32.xlu0 %v178_v3, %s626_s22 }
  0x2b   : > { %240 = vrot.lane.b32.xlu1 %v177_v5, %s626_s22  ;;  %225 = vrot.lane.b32.xlu0 %v668_v1, %s625_s21 }
  0x2f   : > { %276 = vrot.lane.b32.xlu1 %v666_v0, %s623_s20  ;;  %261 = vrot.lane.b32.xlu0 %v194_v6, %s621_s18 }
  0x33   : > { %199 = vrot.lane.b32.xlu1 %v666_v0, %s627_s23  ;;  %197 = vrot.lane.b32.xlu0 %v674_v2, %s627_s23 }
  0x37   : > { %214 = vrot.lane.b32.xlu1 %v178_v3, %s628_s24  ;;  %212 = vrot.lane.b32.xlu0 %v668_v1, %s628_s24 }
  0x3b   : > { %210 = vrot.lane.b32.xlu1 %v177_v5, %s628_s24  ;;  %195 = vrot.lane.b32.xlu0 %v668_v1, %s627_s23 }
  0x3f   : > { %246 = vrot.lane.b32.xlu1 %v666_v0, %s626_s22  ;;  %231 = vrot.lane.b32.xlu0 %v194_v6, %s625_s21 }
  0x43   : > { %183 = vrot.lane.b32.xlu1 %v178_v3, %s630_s25  ;;  %181 = vrot.lane.b32.xlu0 %v668_v1, %s630_s25 }
  0x47   : > { %201 = vrot.lane.b32.xlu1 %v194_v6, %s627_s23  ;;  %179 = vrot.lane.b32.xlu0 %v177_v5, %s630_s25 }
  0x4b   : > { %185 = vrot.lane.b32.xlu1 %v666_v0, %s630_s25  ;;  %216 = vrot.lane.b32.xlu0 %v666_v0, %s628_s24 }
  0x4f   : > { %314 = vperm.xlu0 %596, %v311_v8  }
  0x81   : > { %v260_v9 = vpop.permute.xlu1 %259  ;;  %v290_v10 = vpop.permute.xlu0 %289 }
  0x85   : > { %v273_v11 = vpop.permute.xlu0 %272  ;;  %v258_v12 = vpop.permute.xlu1 %257 }
  0x86   : > { %v265_v19 = vsel %vm263_vm4, %v258_v12, %v260_v9 }
  0x89   : > { %v275_v13 = vpop.permute.xlu1 %274  ;;  %v288_v14 = vpop.permute.xlu0 %287 }
  0x8a   : > { %v295_v15 = vsel %vm293_vm1, %v288_v14, %v290_v10  ;;  %v280_v16 = vsel %vm278_vm3, %v273_v11, %v275_v13 }
  0x8b   : > { %549 = vmatprep.subr.msk.mxu0 %vm297_vm2, %v295_v15  ;;  %v308_v21 = vsel %vm297_vm2, %v265_v19, %v280_v16 }
  0x8d   : > { %v256_v17 = vpop.permute.xlu1 %255  ;;  %v286_v18 = vpop.permute.xlu0 %285 }
  0x8e   : > { %v294_v20 = vsel %vm293_vm1, %v286_v18, %v288_v14  ;;  %v264_v24 = vsel %vm263_vm4, %v256_v17, %v258_v12 }
  0x8f   : > { %550 = vmatpush1.msk.msra.mxu0 %vm297_vm2, %v294_v20 }
  0x90   : > { %351 = vmatprep.subr.mxu0 %v308_v21 }
  0x91   : > { %v228_v22 = vpop.permute.xlu1 %227  ;;  %v271_v23 = vpop.permute.xlu0 %270 }
  0x92   : > { %v279_v25 = vsel %vm278_vm3, %v271_v23, %v273_v11 }
  0x93   : > { %v307_v26 = vsel %vm297_vm2, %v264_v24, %v279_v25 }
  0x94   : > { %352 = vmatpush1.msra.mxu0 %v307_v26 }
  0x95   : > { %v243_v27 = vpop.permute.xlu1 %242  ;;  %v230_v28 = vpop.permute.xlu0 %229 }
  0x96   : > { %v235_v31 = vsel %vm233_vm5, %v228_v22, %v230_v28 }
  0x99   : > { %v292_v29 = vpop.permute.xlu1 %291  ;;  %v245_v30 = vpop.permute.xlu0 %244 }
  0x9a   : > { %v250_v32 = vsel %vm248_vm6, %v243_v27, %v245_v30  ;;  %v296_v33 = vsel %vm293_vm1, %v290_v10, %v292_v29 }
  0x9b   : > { %564 = vmatpush3.msk.msra.mxu1 %vm297_vm2, %v296_v33  ;;  %v305_v34 = vsel %vm297_vm2, %v235_v31, %v250_v32 }
  0x9c   : > { %353 = vmatprep.subr.mxu0 %v305_v34  ;;  %565 = vmatprep.subr.mxu1 %v624_v4 }
  0x9d   : > { %v241_v35 = vpop.permute.xlu1 %240  ;;  %v226_v36 = vpop.permute.xlu0 %225 }
  0x9e   : > { %v249_v37 = vsel %vm248_vm6, %v241_v35, %v243_v27  ;;  %v234_v38 = vsel %vm233_vm5, %v226_v36, %v228_v22 }
  0x9f   : > { %v304_v39 = vsel %vm297_vm2, %v234_v38, %v249_v37 }
  0xa0   : > { %354 = vmatpush1.msra.mxu0 %v304_v39 }
  0xa1   : > { %v277_v40 = vpop.permute.xlu1 %276  ;;  %v262_v41 = vpop.permute.xlu0 %261 }
  0xa2   : > { %v281_v42 = vsel %vm278_vm3, %v275_v13, %v277_v40  ;;  %v266_v43 = vsel %vm263_vm4, %v260_v9, %v262_v41  ;;  %v310_v9 = vld [vmem:[%s763_s1] sm:$0xff] }
  0xa3   : > { %v309_v44 = vsel %vm297_vm2, %v266_v43, %v281_v42 }
  0xa4   : > { %566 = vmatpush3.msra.mxu1 %v309_v44 }
  0xa5   : > { %v200_v45 = vpop.permute.xlu1 %199  ;;  %v198_v46 = vpop.permute.xlu0 %197  ;;  %567 = vmatprep.subr.mxu1 %v624_v4 }
  0xa6   : > { %v205_v49 = vsel %vm203_vm7, %v198_v46, %v200_v45 }
  0xa9   : > { %v215_v47 = vpop.permute.xlu1 %214  ;;  %v213_v48 = vpop.permute.xlu0 %212 }
  0xaa   : > { %v220_v50 = vsel %vm218_vm8, %v213_v48, %v215_v47 }
  0xab   : > { %v302_v51 = vsel %vm297_vm2, %v205_v49, %v220_v50 }
  0xac   : > { %355 = vmatprep.subr.mxu0 %v302_v51 }
  0xad   : > { %v211_v52 = vpop.permute.xlu1 %210  ;;  %v196_v53 = vpop.permute.xlu0 %195 }
  0xae   : > { %v219_v54 = vsel %vm218_vm8, %v211_v52, %v213_v48  ;;  %v204_v55 = vsel %vm203_vm7, %v196_v53, %v198_v46 }
  0xaf   : > { %v301_v56 = vsel %vm297_vm2, %v204_v55, %v219_v54 }
  0xb0   : > { %356 = vmatpush1.msra.mxu0 %v301_v56 }
  0xb1   : > { %v247_v57 = vpop.permute.xlu1 %246  ;;  %v232_v58 = vpop.permute.xlu0 %231 }
  0xb2   : > { %v251_v59 = vsel %vm248_vm6, %v245_v30, %v247_v57  ;;  %v236_v60 = vsel %vm233_vm5, %v230_v28, %v232_v58 }
  0xb3   : > { %v306_v61 = vsel %vm297_vm2, %v236_v60, %v251_v59 }
  0xb4   : > { %568 = vmatpush3.msra.mxu1 %v306_v61 }
  0xb5   : > { %v184_v62 = vpop.permute.xlu1 %183  ;;  %v182_v63 = vpop.permute.xlu0 %181  ;;  %569 = vmatprep.subr.mxu1 %v624_v4 }
  0xb6   : > { %v189_v3 = vsel %vm187_vm9, %v182_v63, %v184_v62 }
  0xb7   : > { %v299_v5 = vsel %vm297_vm2, %v674_v2, %v189_v3 }
  0xb8   : > { %357 = vmatprep.subr.mxu0 %v299_v5 }
  0xb9   : > { %v202_v6 = vpop.permute.xlu1 %201  ;;  %v180_v7 = vpop.permute.xlu0 %179 }
  0xba   : > { %v188_v8 = vsel %vm187_vm9, %v180_v7, %v182_v63  ;;  %v206_v13 = vsel %vm203_vm7, %v200_v45, %v202_v6 }
  0xbb   : > { %v298_v10 = vsel %vm297_vm2, %v668_v1, %v188_v8 }
  0xbc   : > { %358 = vmatpush1.msra.mxu0 %v298_v10 }
  0xbd   : > { %v186_v11 = vpop.permute.xlu1 %185  ;;  %v217_v12 = vpop.permute.xlu0 %216  ;;  %551 = vmatmul.mubr.msk.f32.vlgmr.msra.gmra.mxu0 %vm317_vm10, %v310_v9 }
  0xbe   : > { %v190_v2 = vsel %vm187_vm9, %v184_v62, %v186_v11  ;;  %v221_v14 = vsel %vm218_vm8, %v215_v47, %v217_v12 }
  0xbf   : > { %v303_v15 = vsel %vm297_vm2, %v206_v13, %v221_v14  ;;  %v300_v16 = vsel %vm297_vm2, %v666_v0, %v190_v2 }
  0xc0   : > { %570 = vmatpush3.msra.mxu1 %v303_v15 }
  0xc1   : > { %571 = vmatprep.subr.mxu1 %v624_v4 }
  0xc2   : > { %572 = vmatpush3.msra.mxu1 %v300_v16 }
  0xc3   : > { %574 = vmatmul.mubr.msk.f32.vlgmr.msra.gmra.mxu1 %vm317_vm10, %v310_v9 }
  0xca   : > { %v315_v1 = vpop.permute.xlu0 %314 }
 0x17d   : > { %v393_v17 = vpop.f32.mrf.mxu0 }
 0x17e   : > { %v394_v18 = vadd.f32 %v393_v17, %v315_v1 }
 0x17f   : > { %v395_v19 = vpop.f32.mrf.mxu0 }
 0x180   : > { %v396_v20 = vadd.f32 %v395_v19, %v315_v1  ;;  %v468_v21 = vsub.f32 0.0, %v394_v18 }
 0x182   : > { %v469_v22 = vsub.f32 0.0, %v396_v20  ;;  %v471_v23 = vmul.f32 1.442695, %v468_v21 }
 0x183   : > { %v464_v24 = vpop.f32.mrf.mxu1 }
 0x184   : > { %601 = vpow2.f32 %v471_v23  ;;  %v473_v25 = vmul.f32 1.442695, %v469_v22  ;;  %v465_v26 = vadd.f32 %v464_v24, %v315_v1 }
 0x185   : > { %v575_v27 = vpop.f32.mrf.mxu1 }
 0x186   : > { %603 = vpow2.f32 %v473_v25  ;;  %v470_v4 = vsub.f32 0.0, %v465_v26 }
 0x188   : > { %v475_v28 = vmul.f32 1.442695, %v470_v4 }
 0x18a   : > { %605 = vpow2.f32 %v475_v28 }
 0x191   : > { %v602_v0 = vpop.eup %601 }
 0x192   : > { %v477_v29 = vadd.f32 1.0, %v602_v0 }
 0x193   : > { %v604_v30 = vpop.eup %603 }
 0x194   : > { %v478_v31 = vadd.f32 1.0, %v604_v30  ;;  %607 = vrcp.f32 %v477_v29 }
 0x196   : > { %609 = vrcp.f32 %v478_v31 }
 0x197   : > { %v606_v32 = vpop.eup %605 }
 0x198   : > { %v479_v33 = vadd.f32 1.0, %v606_v32 }
 0x19a   : > { %611 = vrcp.f32 %v479_v33 }
 0x1a1   : > { %v608_v34 = vpop.eup %607 }
 0x1a2   : > { %483 = vst [vmem:[%s170_s6] sm:$0xff] %v608_v34 }
 0x1a3   : > { %v610_v35 = vpop.eup %609 }
 0x1a4   : > { %484 = vst [vmem:[%s170_s6 + $0x8] sm:$0xff] %v610_v35 }
 0x1a7   : > { %v612_v36 = vpop.eup %611 }
 0x1a8   : > { %485 = vst [vmem:[%s170_s6 + $0x10] sm:$0xff] %v612_v36 }
 0x1a9 PF: > { %s13_s12 = sadd.s32 1, %s619_s12  }
 0x1aa   : > { %p10_p4 = scmp.ge.s32.totalorder %s13_s12, 4  }
 0x1ac   :  { %12 = sbr.rel (!%p10_p4) target bundleno = 1 (0x1), region = 62 }

</bundles_post_ra>
